<compile_context>
chip_gen: v7x
topology: tpu7x:2x2x1
jax: 0.10.0
libtpu: 0.0.40
codegen_flags: <defaults>
</compile_context>

<pallas_src>
import functools

import jax
import jax.numpy as jnp
import numpy as np
from jax.experimental import pallas as pl
from jax.experimental.pallas import tpu as pltpu

_ONE_HOT_EPS = 1e-6  # matches `one_hot(..., eps=1e-6)` in the PyTorch reference


def _round_up(a: int, b: int) -> int:
    return ((a + b - 1) // b) * b


def _choose_tile_k(k: int, c: int) -> int:
    """Lane-dense spatial tile: multiple of 128, ~<=2 MiB of f32 per x block."""
    k128 = _round_up(k, 128)
    budget = (2 * 1024 * 1024) // max(1, c * 4)          # elements per block-row budget
    budget = max(128, (budget // 128) * 128)
    return min(k128, budget, 2048)


def _dice_loss_kernel(x_ref, t_ref, o_ref, inter_acc, card_acc, *,
                      eps, eps_oh, k_valid, needs_mask):
    kt = pl.program_id(1)

    @pl.when(kt == 0)
    def _init():
        inter_acc[...] = jnp.zeros_like(inter_acc)
        card_acc[...] = jnp.zeros_like(card_acc)

    x = x_ref[...].astype(jnp.float32)        # (C, TK)
    labels = t_ref[...]                       # (1, TK) int32
    c, tk = x.shape

    if needs_mask:
        col = kt * tk + jax.lax.broadcasted_iota(jnp.int32, (1, tk), 1)
        valid_b = col < k_valid               # (1, TK) bool
        # Zero padded columns BEFORE exp so ragged-block garbage never becomes
        # inf/NaN (inf * 0 = NaN would otherwise poison the reduction).
        x = jnp.where(valid_b, x, 0.0)
        valid = valid_b.astype(jnp.float32)

    # Numerically-stable softmax over the channel (sublane) axis.
    m = jnp.max(x, axis=0, keepdims=True)     # (1, TK)
    e = jnp.exp(x - m)                        # (C, TK) — 1 EUP transcendental / element
    s = jnp.sum(e, axis=0, keepdims=True)     # (1, TK)
    p = e * (1.0 / s)                         # one divide per column, multiplies elsewhere

    # one_hot(target) + eps, built in-register via an iota compare (no gather).
    ch = jax.lax.broadcasted_iota(jnp.int32, (c, tk), 0)
    one_hot = jnp.where(ch == labels, 1.0, 0.0) + eps_oh

    # Per-column partial sums over channels, accumulated across K tiles.
    inter_col = jnp.sum(p * one_hot, axis=0, keepdims=True)   # (1, TK)
    card_col = jnp.sum(p + one_hot, axis=0, keepdims=True)    # (1, TK)
    if needs_mask:
        inter_col = inter_col * valid
        card_col = card_col * valid

    inter_acc[...] += inter_col
    card_acc[...] += card_col

    @pl.when(kt == pl.num_programs(1) - 1)
    def _finalize():
        intersection = jnp.sum(inter_acc[...], axis=1, keepdims=True)  # (1, 1)
        cardinality = jnp.sum(card_acc[...], axis=1, keepdims=True)    # (1, 1)
        o_ref[...] = 1.0 - 2.0 * intersection / (cardinality + eps)


def dice_loss(input: jax.Array, target: jax.Array, reduction: str = "mean",
              eps: float = 1e-08) -> jax.Array:
    if input.ndim != 4:
        raise ValueError(f"Invalid input shape, we expect BxNxHxW. Got: {input.shape}")
    if input.shape[-2:] != target.shape[-2:]:
        raise ValueError(
            f"input and target shapes must be the same. Got: {input.shape} and {target.shape}"
        )
    if input.shape[0] != target.shape[0]:
        raise ValueError(
            f"Expected input batch_size ({input.shape[0]}) to match target "
            f"batch_size ({target.shape[0]})."
        )

    n, c, h, w = input.shape
    k = h * w

    x = input.reshape(n, c, k)                       # keep original dtype; cast in-kernel
    t = target.reshape(n, 1, k).astype(jnp.int32)

    tk = _choose_tile_k(k, c)
    num_kt = pl.cdiv(k, tk)
    needs_mask = (k % tk) != 0

    kernel = functools.partial(
        _dice_loss_kernel, eps=float(eps), eps_oh=_ONE_HOT_EPS,
        k_valid=k, needs_mask=needs_mask,
    )

    k_pad = num_kt * tk
    cost = pl.CostEstimate(
        flops=int(12 * n * c * k_pad),
        transcendentals=int(n * c * k_pad),
        bytes_accessed=int(
            x.size * x.dtype.itemsize + t.size * t.dtype.itemsize + n * 4
        ),
    )

    loss = pl.pallas_call(
        kernel,
        out_shape=jax.ShapeDtypeStruct((n, 1, 1), jnp.float32),
        grid=(n, num_kt),
        in_specs=[
            # (None, ...) squeezes the batch dim out of the kernel Ref.
            pl.BlockSpec((None, c, tk), lambda i, j: (i, 0, j)),
            pl.BlockSpec((None, 1, tk), lambda i, j: (i, 0, j)),
        ],
        out_specs=pl.BlockSpec((None, 1, 1), lambda i, j: (i, 0, 0)),
        scratch_shapes=[
            pltpu.VMEM((1, tk), jnp.float32),   # intersection partial sums (per column)
            pltpu.VMEM((1, tk), jnp.float32),   # cardinality partial sums (per column)
        ],
        compiler_params=pltpu.CompilerParams(
            dimension_semantics=("parallel", "arbitrary"),
        ),
        cost_estimate=cost,
    )(x, t)

    loss = loss.reshape(n)
    if reduction == "none":
        return loss
    if reduction == "mean":
        return jnp.mean(loss)
    if reduction == "sum":
        return jnp.sum(loss)
    raise NotImplementedError(f"Invalid reduction mode: {reduction}")


class DiceLoss:
    """JAX/Pallas port of the PyTorch DiceLoss module (forward pass)."""

    def __init__(self, reduction: str = "mean", eps: float = 1e-08):
        self.reduction = reduction
        self.eps = eps

    def __call__(self, input: jax.Array, target: jax.Array) -> jax.Array:
        return dice_loss(input, target, self.reduction, self.eps)


def _reference(logits, target, reduction, eps):
    x = logits.astype(jnp.float32)
    p = jax.nn.softmax(x, axis=1)
    c = x.shape[1]
    oh = jax.nn.one_hot(target, c, axis=1, dtype=jnp.float32) + _ONE_HOT_EPS
    dims = (1, 2, 3)
    inter = jnp.sum(p * oh, axis=dims)
    card = jnp.sum(p + oh, axis=dims)
    loss = 1.0 - 2.0 * inter / (card + eps)
    if reduction == "sum":
        return jnp.sum(loss)
    if reduction == "mean":
        return jnp.mean(loss)
    return loss


if __name__ == "__main__":
    key = jax.random.PRNGKey(0)
    k1, k2, k3, k4 = jax.random.split(key, 4)

    # --- Case 1: small NCHW, single K tile (K=256 is already a multiple of 128) ---
    N, C, H, W = 2, 4, 16, 16
    logits = jax.random.normal(k1, (N, C, H, W), dtype=jnp.float32)
    target = jax.random.randint(k2, (N, H, W), 0, C, dtype=jnp.int32)

    crit_mean = DiceLoss(reduction="mean")
    out_mean = jax.block_until_ready(crit_mean(logits, target))
    ref_mean = _reference(logits, target, "mean", 1e-08)
    np.testing.assert_allclose(np.asarray(out_mean), np.asarray(ref_mean),
                               rtol=1e-5, atol=1e-6)

    crit_none = DiceLoss(reduction="none")
    out_none = jax.block_until_ready(crit_none(logits, target))
    ref_none = _reference(logits, target, "none", 1e-08)
    assert out_none.shape == (N,)
    np.testing.assert_allclose(np.asarray(out_none), np.asarray(ref_none),
                               rtol=1e-5, atol=1e-6)

    # --- Case 2: K=2500 (not a multiple of 128) -> exercises the ragged last
    #     block + in-kernel masking and the multi-tile (num_kt=2) accumulator
    #     path, plus 'sum' reduction. ---
    N2, C2, H2, W2 = 1, 3, 50, 50
    logits2 = jax.random.normal(k3, (N2, C2, H2, W2), dtype=jnp.float32)
    target2 = jax.random.randint(k4, (N2, H2, W2), 0, C2, dtype=jnp.int32)

    crit_sum = DiceLoss(reduction="sum")
    out_sum = jax.block_until_ready(crit_sum(logits2, target2))
    ref_sum = _reference(logits2, target2, "sum", 1e-08)
    np.testing.assert_allclose(np.asarray(out_sum), np.asarray(ref_sum),
                               rtol=1e-5, atol=1e-6)

    print("KERNEL_OK")
</pallas_src>

<mosaic_0001>
module attributes {stable_mosaic.version = 11 : i64} {
  func.func @_dice_loss_kernel(%arg0: i32, %arg1: i32, %arg2: memref<1x4x256xf32, #tpu.memory_space<vmem>>, %arg3: memref<1x1x256xi32, #tpu.memory_space<vmem>>, %arg4: memref<1x1x1xf32, #tpu.memory_space<vmem>>, %arg5: memref<1x256xf32, #tpu.memory_space<vmem>>, %arg6: memref<1x256xf32, #tpu.memory_space<vmem>>) attributes {dimension_semantics = [#tpu.dimension_semantics<parallel>, #tpu.dimension_semantics<arbitrary>], iteration_bounds = array<i64: 2, 1>, scalar_prefetch = 0 : i64, scratch_operands = 2 : i64, tpu.core_type = #tpu.core_type<tc>, window_params = [{transform_indices = @transform_0, window_bounds = array<i64: 1, 4, 256>}, {transform_indices = @transform_1, window_bounds = array<i64: 1, 1, 256>}, {transform_indices = @transform_2, window_bounds = array<i64: 1, 1, 1>}]} {
    %c0_i32 = arith.constant 0 : i32
    %0 = arith.cmpi eq, %arg1, %c0_i32 : i32
    %1 = arith.extui %0 : i1 to i32
    %c0_i32_0 = arith.constant 0 : i32
    %2 = arith.cmpi ne, %1, %c0_i32_0 : i32
    scf.if %2 {
      %cst_23 = arith.constant 0.000000e+00 : f32
      %41 = vector.broadcast %cst_23 : f32 to vector<1x256xf32>
      %c0_24 = arith.constant 0 : index
      %c0_25 = arith.constant 0 : index
      %42 = vector.load %arg5[%c0_24, %c0_25] : memref<1x256xf32, #tpu.memory_space<vmem>>, vector<1x256xf32>
      tpu.vector_store %arg5[%c0_24, %c0_25], %41 {strides = array<i32>} : memref<1x256xf32, #tpu.memory_space<vmem>>, vector<1x256xf32>,
      %cst_26 = arith.constant 0.000000e+00 : f32
      %43 = vector.broadcast %cst_26 : f32 to vector<1x256xf32>
      %c0_27 = arith.constant 0 : index
      %c0_28 = arith.constant 0 : index
      %44 = vector.load %arg6[%c0_27, %c0_28] : memref<1x256xf32, #tpu.memory_space<vmem>>, vector<1x256xf32>
      tpu.vector_store %arg6[%c0_27, %c0_28], %43 {strides = array<i32>} : memref<1x256xf32, #tpu.memory_space<vmem>>, vector<1x256xf32>,
    } else {
    }
    %c0 = arith.constant 0 : index
    %c0_1 = arith.constant 0 : index
    %c0_2 = arith.constant 0 : index
    %3 = vector.load %arg2[%c0, %c0_1, %c0_2] : memref<1x4x256xf32, #tpu.memory_space<vmem>>, vector<1x4x256xf32>
    %4 = vector.shape_cast %3 : vector<1x4x256xf32> to vector<4x256xf32>
    %c0_3 = arith.constant 0 : index
    %c0_4 = arith.constant 0 : index
    %c0_5 = arith.constant 0 : index
    %5 = vector.load %arg3[%c0_3, %c0_4, %c0_5] : memref<1x1x256xi32, #tpu.memory_space<vmem>>, vector<1x1x256xi32>
    %6 = vector.shape_cast %5 : vector<1x1x256xi32> to vector<1x256xi32>
    %cst = arith.constant dense<0xFF800000> : vector<256xf32>
    %7 = vector.multi_reduction <maximumf>, %4, %cst [0] : vector<4x256xf32> to vector<256xf32>
    %8 = vector.shape_cast %7 : vector<256xf32> to vector<1x256xf32>
    %9 = vector.broadcast %8 : vector<1x256xf32> to vector<4x256xf32>
    %10 = arith.subf %4, %9 : vector<4x256xf32>
    %11 = math.exp %10 : vector<4x256xf32>
    %cst_6 = arith.constant dense<0.000000e+00> : vector<256xf32>
    %12 = vector.multi_reduction <add>, %11, %cst_6 [0] : vector<4x256xf32> to vector<256xf32>
    %13 = vector.shape_cast %12 : vector<256xf32> to vector<1x256xf32>
    %cst_7 = arith.constant 1.000000e+00 : f32
    %14 = vector.broadcast %cst_7 : f32 to vector<1x256xf32>
    %15 = arith.divf %14, %13 : vector<1x256xf32>
    %16 = vector.broadcast %15 : vector<1x256xf32> to vector<4x256xf32>
    %17 = arith.mulf %11, %16 : vector<4x256xf32>
    %18 = tpu.iota {dimensions = array<i32: 0>} : vector<4x256xi32>
    %19 = vector.broadcast %6 : vector<1x256xi32> to vector<4x256xi32>
    %20 = arith.cmpi eq, %18, %19 : vector<4x256xi32>
    %cst_8 = arith.constant 1.000000e+00 : f32
    %cst_9 = arith.constant 0.000000e+00 : f32
    %21 = vector.broadcast %cst_8 : f32 to vector<4x256xf32>
    %22 = vector.broadcast %cst_9 : f32 to vector<4x256xf32>
    %23 = arith.select %20, %21, %22 : vector<4x256xi1>, vector<4x256xf32>
    %cst_10 = arith.constant 9.99999997E-7 : f32
    %24 = vector.broadcast %cst_10 : f32 to vector<4x256xf32>
    %25 = arith.addf %23, %24 : vector<4x256xf32>
    %26 = arith.mulf %17, %25 : vector<4x256xf32>
    %cst_11 = arith.constant dense<0.000000e+00> : vector<256xf32>
    %27 = vector.multi_reduction <add>, %26, %cst_11 [0] : vector<4x256xf32> to vector<256xf32>
    %28 = vector.shape_cast %27 : vector<256xf32> to vector<1x256xf32>
    %29 = arith.addf %17, %25 : vector<4x256xf32>
    %cst_12 = arith.constant dense<0.000000e+00> : vector<256xf32>
    %30 = vector.multi_reduction <add>, %29, %cst_12 [0] : vector<4x256xf32> to vector<256xf32>
    %31 = vector.shape_cast %30 : vector<256xf32> to vector<1x256xf32>
    %c0_13 = arith.constant 0 : index
    %c0_14 = arith.constant 0 : index
    %32 = vector.load %arg5[%c0_13, %c0_14] : memref<1x256xf32, #tpu.memory_space<vmem>>, vector<1x256xf32>
    %33 = arith.addf %32, %28 : vector<1x256xf32>
    %c0_15 = arith.constant 0 : index
    %c0_16 = arith.constant 0 : index
    %34 = vector.load %arg5[%c0_15, %c0_16] : memref<1x256xf32, #tpu.memory_space<vmem>>, vector<1x256xf32>
    tpu.vector_store %arg5[%c0_15, %c0_16], %33 {strides = array<i32>} : memref<1x256xf32, #tpu.memory_space<vmem>>, vector<1x256xf32>,
    %c0_17 = arith.constant 0 : index
    %c0_18 = arith.constant 0 : index
    %35 = vector.load %arg6[%c0_17, %c0_18] : memref<1x256xf32, #tpu.memory_space<vmem>>, vector<1x256xf32>
    %36 = arith.addf %35, %31 : vector<1x256xf32>
    %c0_19 = arith.constant 0 : index
    %c0_20 = arith.constant 0 : index
    %37 = vector.load %arg6[%c0_19, %c0_20] : memref<1x256xf32, #tpu.memory_space<vmem>>, vector<1x256xf32>
    tpu.vector_store %arg6[%c0_19, %c0_20], %36 {strides = array<i32>} : memref<1x256xf32, #tpu.memory_space<vmem>>, vector<1x256xf32>,
    %c0_i32_21 = arith.constant 0 : i32
    %38 = arith.cmpi eq, %arg1, %c0_i32_21 : i32
    %39 = arith.extui %38 : i1 to i32
    %c0_i32_22 = arith.constant 0 : i32
    %40 = arith.cmpi ne, %39, %c0_i32_22 : i32
    scf.if %40 {
      %c0_23 = arith.constant 0 : index
      %c0_24 = arith.constant 0 : index
      %41 = vector.load %arg5[%c0_23, %c0_24] : memref<1x256xf32, #tpu.memory_space<vmem>>, vector<1x256xf32>
      %cst_25 = arith.constant dense<0.000000e+00> : vector<1xf32>
      %42 = vector.multi_reduction <add>, %41, %cst_25 [1] : vector<1x256xf32> to vector<1xf32>
      %43 = vector.shape_cast %42 : vector<1xf32> to vector<1x1xf32>
      %c0_26 = arith.constant 0 : index
      %c0_27 = arith.constant 0 : index
      %44 = vector.load %arg6[%c0_26, %c0_27] : memref<1x256xf32, #tpu.memory_space<vmem>>, vector<1x256xf32>
      %cst_28 = arith.constant dense<0.000000e+00> : vector<1xf32>
      %45 = vector.multi_reduction <add>, %44, %cst_28 [1] : vector<1x256xf32> to vector<1xf32>
      %46 = vector.shape_cast %45 : vector<1xf32> to vector<1x1xf32>
      %cst_29 = arith.constant 2.000000e+00 : f32
      %47 = vector.broadcast %cst_29 : f32 to vector<1x1xf32>
      %48 = arith.mulf %47, %43 : vector<1x1xf32>
      %cst_30 = arith.constant 9.99999993E-9 : f32
      %49 = vector.broadcast %cst_30 : f32 to vector<1x1xf32>
      %50 = arith.addf %46, %49 : vector<1x1xf32>
      %51 = arith.divf %48, %50 : vector<1x1xf32>
      %cst_31 = arith.constant 1.000000e+00 : f32
      %52 = vector.broadcast %cst_31 : f32 to vector<1x1xf32>
      %53 = arith.subf %52, %51 : vector<1x1xf32>
      %c0_32 = arith.constant 0 : index
      %c0_33 = arith.constant 0 : index
      %c0_34 = arith.constant 0 : index
      %54 = vector.load %arg4[%c0_32, %c0_33, %c0_34] : memref<1x1x1xf32, #tpu.memory_space<vmem>>, vector<1x1x1xf32>
      %55 = vector.shape_cast %54 : vector<1x1x1xf32> to vector<1x1xf32>
      %56 = vector.shape_cast %53 : vector<1x1xf32> to vector<1x1x1xf32>
      tpu.vector_store %arg4[%c0_32, %c0_33, %c0_34], %56 {strides = array<i32>} : memref<1x1x1xf32, #tpu.memory_space<vmem>>, vector<1x1x1xf32>,
    } else {
    }
    return
  }
  func.func @transform_0(%arg0: i32, %arg1: i32) -> (i32, i32, i32) {
    %c0_i32 = arith.constant 0 : i32
    %c0_i32_0 = arith.constant 0 : i32
    return %arg0, %c0_i32, %arg1 : i32, i32, i32
  }
  func.func @transform_1(%arg0: i32, %arg1: i32) -> (i32, i32, i32) {
    %c0_i32 = arith.constant 0 : i32
    %c0_i32_0 = arith.constant 0 : i32
    return %arg0, %c0_i32, %arg1 : i32, i32, i32
  }
  func.func @transform_2(%arg0: i32, %arg1: i32) -> (i32, i32, i32) {
    %c0_i32 = arith.constant 0 : i32
    %c0_i32_0 = arith.constant 0 : i32
    %c0_i32_1 = arith.constant 0 : i32
    return %arg0, %c0_i32, %c0_i32_0 : i32, i32, i32
  }
}

</mosaic_0001>

<bundles_post_ra>
// kernel: tpu_custom_call.1
= control target key start
LH: loop header
LB: loop body
LE: loop exit
PB: predicated region body
PF: predicated region fallthrough
CT: control target
= control target key end

     0   :  { %7 = vsyncpa [#allocation5], 0  ;;  %s953_s0 = inlined_call_operand.hbm [shape: f32[2,4,256], index: 0, kind: input, shape index: {}]   ;;  %s954_s1 = inlined_call_operand.hbm [shape: s32[2,1,256], index: 1, kind: input, shape index: {}]   ;;  %s955_s2 = inlined_call_operand.vmem [shape: f32[2,1,1], index: 2, kind: output, shape index: {}]  }
   0x1   :  { %9 = vsyncpa [#allocation5 + $0x1], 0 }
   0x2   :  { %10 = vsyncpa [#allocation7], 0 }
   0x3   :  { %12 = vsyncpa [#allocation7 + $0x1], 0  ;;  %s747_s9 = smov 0   ;;  %s749_s10 = smov 0  }
   0x4   :  { %s751_s11 = smov 0   ;;  %s753_s12 = smov 0  }
   0x5   :  { %s755_s13 = smov 0   ;;  %s757_s14 = smov 0  }
   0x6 LB: > { %s524_s15 = sadd.s32 4294967295, %s726_s14   ;;  %s30_s16 = sadd.s32 1, %s722_s13  ;;  %s726_s14 = sphi %s757_s14, %s18_s14   ;;  %s722_s13 = sphi %s755_s13, %s971_s13   ;;  %s718_s12 = sphi %s753_s12, %s970_s12   ;;  %s714_s11 = sphi %s751_s11, %s969_s11   ;;  %s710_s10 = sphi %s749_s10, %s968_s10   ;;  %s706_s9 = sphi %s747_s9, %s967_s9  }
   0x7   : > { %p32_p0 = scmp.ge.s32.totalorder %s30_s16, 2  ;;  %s39_s17 = sadd.s32 1, %s714_s11 }
   0x8   : > { %p46_p1 = scmp.ne.s32.totalorder %s714_s11, %s710_s10  ;;  %p47_p2 = scmp.eq.s32.totalorder %s726_s14, 0 }
   0x9   : > { %s973_s16 = smov (%p32_p0, %s30_s16), 0  ;;  %p52_p4 = scmp.ne.s32.totalorder %s710_s10, %s706_s9 }
   0xa   : > { %p783_p3 = por %p47_p2, %p46_p1  ;;  %s34_s19 = ssub.s32 %s722_s13, %s973_s16 }
   0xb   : > { %p53_p5 = scmp.eq.s32.totalorder %s524_s15, 0  ;;  %p37_p6 = scmp.eq.s32.totalorder %s34_s19, 0 }
   0xc   : > { %p552_p8 = scmp.lt.s32.totalorder %s726_s14, 2  ;;  %s799_s22 = sand.u32 1, %s714_s11  }
   0xd   : > { %p790_p7 = por %p53_p5, %p52_p4  ;;  %s539_s23 = sshll.u32 %s722_s13, 7 }
   0xe   : > { %s796_s21 = scalar_select %p37_p6, %s714_s11, %s39_s17  }
   0xf   : > { %s958_s20 = scalar_select %p790_p7, 1, 0 }
  0x10   : > { %s528_s24 = sshll.u32 %s799_s22, 3  ;;  %s806_s27 = scalar_lea.hbm %s953_s0, %s539_s23 }
  0x11   : > { %s134_s28 = scalar_lea.vmem [#allocation4], %s528_s24  ;;  %p810_p9 = pnand %p552_p8, %p783_p3 }
  0x12   : > { %s144_s29 = sshll.u32 %s134_s28, 4  ;;  %s131_s3 = scalar_lea.sflag [#allocation5], %s799_s22  ;;  %s814_s29 = int_to_ptr.vmem [resolvable:$true] %s144_s29 }
  0x13   : > { %s612_s4 = scalar_lea.hbm %s806_s27, 128  ;;  %p614_p13 = pneg %p810_p9 }
  0x14   : > { %p613_p12 = scmp.ne.s32.totalorder %s806_s27, %s612_s4  ;;  %s617_s7 = scalar_lea.hbm %s953_s0, 256 }
  0x15   : > { %p618_p2 = scmp.lt.u32.totalorder %s806_s27, %s953_s0  ;;  %p619_p3 = scmp.lt.u32.totalorder %s617_s7, %s612_s4 }
  0x16   : > { %p615_p0 = pnand %p614_p13, %p613_p12  ;;  %p621_p5 = scmp.lt.u32.totalorder %s612_s4, %s806_s27 }
  0x17   : > { %p620_p4 = por %p619_p3, %p618_p2 }
  0x18   : > { %p616_p1 = pneg %p615_p0 }
  0x19   : > { %p622_p6 = por %p621_p5, %p620_p4 }
  0x1b   : > { %p623_p8 = pnand %p622_p6, %p616_p1 }
  0x1d   : > { %626 = shalt.err (!%p623_p8)
}
  0x1e   : > { %s627_s15 = scalar_lea.vmem %s814_s29, 128  ;;  %s728_s17 = smov [#allocation4]  }
  0x1f   : > { %p628_p12 = scmp.ne.s32.totalorder %s814_s29, %s627_s15  ;;  %s632_s18 = sshll.u32 %s728_s17, 4  ;;  %s633_s18 = int_to_ptr.vmem [resolvable:$false] %s632_s18 }
  0x20   : > { %s634_s19 = scalar_lea.vmem %s633_s18, 256  ;;  %p635_p11 = scmp.lt.s32.totalorder %s814_s29, %s633_s18 }
  0x21   : > { %p630_p0 = pnand %p628_p12, %p614_p13  ;;  %p636_p2 = scmp.lt.s32.totalorder %s634_s19, %s627_s15 }
  0x23   : > { %p631_p10 = pneg %p630_p0  ;;  %p637_p3 = por %p636_p2, %p635_p11 }
  0x25   : > { %p638_p4 = pnand %p637_p3, %p631_p10 }
  0x27   : > { %641 = shalt.err (!%p638_p4)
}
  0x28   : > { %548 = dma.hbm_to_vmem [thread:$0]  (!%p810_p9), %s806_s27, 128, %s814_s29, %s131_s3  }
  0x29   : > { %p960_p1 = scmp.lt.s32.totalorder %s726_s14, 3  ;;  %p961_p5 = scmp.ge.s32.totalorder %s726_s14, 1 }
  0x2a   : > { %s531_s24 = sshll.u32 %s799_s22, 1  ;;  %s540_s25 = sshll.u32 %s722_s13, 5 }
  0x2b   : > { %p848_p6 = pnand %p961_p5, %p960_p1  ;;  %s857_s4 = scalar_lea.hbm %s954_s1, %s540_s25 }
  0x2c   : > { %s155_s5 = scalar_lea.vmem [#allocation6], %s531_s24  ;;  %s152_s27 = scalar_lea.sflag [#allocation7], %s799_s22 }
  0x2d   : > { %s962_s23 = scalar_select %p848_p6, 1, 0 }
  0x2e   : > { %s165_s6 = sshll.u32 %s155_s5, 4  ;;  %s642_s29 = scalar_lea.hbm %s857_s4, 32  ;;  %s166_s6 = int_to_ptr.vmem [resolvable:$true] %s165_s6 }
  0x2f   : > { %p643_p10 = scmp.ne.s32.totalorder %s857_s4, %s642_s29  ;;  %s647_s8 = scalar_lea.hbm %s954_s1, 64 }
  0x30   : > { %p648_p12 = scmp.lt.u32.totalorder %s857_s4, %s954_s1  ;;  %p649_p0 = scmp.lt.u32.totalorder %s647_s8, %s642_s29 }
  0x31   : > { %p645_p11 = pnand %p643_p10, %p614_p13  ;;  %p651_p3 = scmp.lt.u32.totalorder %s642_s29, %s857_s4 }
  0x32   : > { %p650_p2 = por %p649_p0, %p648_p12 }
  0x33   : > { %p646_p8 = pneg %p645_p11 }
  0x34   : > { %p652_p4 = por %p651_p3, %p650_p2 }
  0x36   : > { %p653_p1 = pnand %p652_p4, %p646_p8 }
  0x38   : > { %656 = shalt.err (!%p653_p1)
}
  0x39   : > { %s657_s22 = scalar_lea.vmem %s166_s6, 32  ;;  %s729_s17 = smov [#allocation6]  }
  0x3a   : > { %p658_p5 = scmp.ne.s32.totalorder %s166_s6, %s657_s22  ;;  %s662_s18 = sshll.u32 %s729_s17, 4  ;;  %s663_s18 = int_to_ptr.vmem [resolvable:$false] %s662_s18 }
  0x3b   : > { %s664_s19 = scalar_lea.vmem %s663_s18, 64  ;;  %p665_p7 = scmp.lt.s32.totalorder %s166_s6, %s663_s18 }
  0x3c   : > { %p660_p10 = pnand %p658_p5, %p614_p13  ;;  %p666_p6 = scmp.lt.s32.totalorder %s664_s19, %s657_s22 }
  0x3e   : > { %p661_p11 = pneg %p660_p10  ;;  %p667_p0 = por %p666_p6, %p665_p7 }
  0x40   : > { %p668_p12 = pnand %p667_p0, %p661_p11 }
  0x42   : > { %671 = shalt.err (!%p668_p12)
}
  0x43   : > { %551 = dma.hbm_to_vmem [thread:$0]  (!%p810_p9), %s857_s4, 32, %s166_s6, %s152_s27  }
  0x44   : > { %p963_p8 = scmp.ne.s32.totalorder %s962_s23, 0 }
  0x45   : > { %s176_s24 = sand.u32 (!%p963_p8), 1, %s710_s10   ;;  %p964_p13 = scmp.ne.s32.totalorder (!%p963_p8), %s958_s20, 0 }
  0x46   : > { %174 = sbr.rel (%p963_p8) target bundleno = 342 (0x156), region = 28  ;;  %s535_s25 = sshll.u32 (!%p963_p8), %s176_s24, 3 }
  0x47   : > { %s177_s26 = scalar_lea.sflag (!%p963_p8), [#allocation5], %s176_s24  ;;  %s180_s28 = scalar_lea.vmem (!%p963_p8), [#allocation4], %s535_s25 }
  0x4d   : > { %697 = dma.done.wait (%p964_p13), %s177_s26, 128  }
  0x4e   : > { %699 = vsyncadd (%p964_p13), %s177_s26, 4294967168  ;;  %s536_s5 = sshll.u32 %s176_s24, 1  ;;  %s186_s29 = scalar_lea.sflag [#allocation7], %s176_s24 }
  0x4f   : > { %s886_s30 = scalar_lea.vmem [#allocation6], %s536_s5 }
  0x50   : > { %701 = dma.done.wait (%p964_p13), %s186_s29, 32  }
  0x51   : > { %703 = vsyncadd (%p964_p13), %s186_s29, 4294967264  ;;  %v222_v0 = vlaneseq  ;;  %v730_v2 = vmov 0.0   ;;  %vm233_vm1 = vcmask 1043456   ;;  %v228_v3 = vld [vmem:[%s180_s28] sm:$0xff]  ;;  %v229_v36 = vld [vmem:[%s886_s30] sm:$0x3] }
  0x52   : > { %v231_v4 = vcombine.high %v228_v3, %v228_v3  ;;  %v234_v5 = vsel %vm233_vm1, %v228_v3, -inf  ;;  %vm398_vm4 = vcmask 1040384   ;;  %p215_p7 = scmp.lt.s32.totalorder %s718_s12, 1  ;;  %vm426_vm5 = vcmask 0  }
  0x53   : > { %vm892_vm0 = vcmp.lt.s32.totalorder %v222_v0, 256  ;;  %v235_v6 = vrot.slane %v234_v5, 4  ;;  %v904_v29 = vshrl.u32 %v222_v0, 7 }
  0x54   : > { %227 = vst.msk [vmem:[#allocation3] sm:$0x3] %vm892_vm0, %v730_v2  ;;  %226 = vst.msk [vmem:[#allocation2] sm:$0x3] %vm892_vm0, %v730_v2  ;;  %v241_v7 = vsel %vm233_vm1, %v231_v4, -inf  ;;  %s975_s12 = smov (!%p215_p7, %s718_s12), 1 }
  0x55   : > { %v236_v8 = vmax.f32 %v234_v5, %v235_v6  ;;  %v242_v9 = vrot.slane %v241_v7, 4  ;;  %v907_v34 = vsub.s32 0, %v904_v29  ;;  %v910_v35 = vsub.s32 1, %v904_v29  ;;  %s217_s4 = scalar_lea.vmem %s955_s2, %s975_s12 }
  0x56   : > { %v731_v4 = vmov 1966171168  }
  0x57   : > { %v237_v10 = vrot.slane %v236_v8, 2  ;;  %v243_v11 = vmax.f32 %v241_v7, %v242_v9  ;;  %v286_v41 = vrot.slane %v229_v36, %v907_v34  ;;  %v290_v42 = vrot.slane %v229_v36, %v910_v35 }
  0x58   : > { %v342_v5 = vunpack.c.l.s4 %v731_v4 }
  0x59   : > { %v238_v12 = vmax.f32 %v236_v8, %v237_v10  ;;  %v244_v13 = vrot.slane %v243_v11, 2  ;;  %vm291_vm2 = vcmp.eq.s32.totalorder %v904_v29, %v286_v41  ;;  %vm292_vm3 = vcmp.eq.s32.totalorder %v904_v29, %v290_v42 }
  0x5a   : > { %v293_v44 = vsel %vm291_vm2, 1.0, %v730_v2  ;;  %v294_v45 = vsel %vm292_vm3, 1.0, %v730_v2 }
  0x5b   : > { %v239_v14 = vrot.slane %v238_v12, 1  ;;  %v245_v15 = vmax.f32 %v243_v11, %v244_v13  ;;  %v295_v46 = vadd.f32 1e-06, %v293_v44  ;;  %v296_v47 = vadd.f32 1e-06, %v294_v45 }
  0x5d   : > { %v240_v16 = vmax.f32 %v238_v12, %v239_v14  ;;  %v246_v17 = vrot.slane %v245_v15, 1  ;;  %v299_v51 = vcombine.low %v295_v46, %v296_v47  ;;  %v343_v14 = vunpack.c.0.s8 %v342_v5 }
  0x5f   : > { %v247_v18 = vmax.f32 %v245_v15, %v246_v17 }
  0x61   : > { %v250_v19 = vcombine.low %v240_v16, %v247_v18 }
  0x63   : > { %v252_v20 = vsub.f32 %v228_v3, %v250_v19 }
  0x65   : > { %v253_v21 = vmul.f32 1.442695, %v252_v20 }
  0x67   : > { %604 = vpow2.f32 %v253_v21 }
  0x71   : > { %v605_v22 = vpop.eup %604 }
  0x72   : > { %v256_v23 = vcombine.high %v605_v22, %v605_v22  ;;  %v258_v24 = vsel %vm233_vm1, %v605_v22, 0.0 }
  0x73   : > { %v259_v25 = vrot.slane %v258_v24, 4 }
  0x74   : > { %v265_v26 = vsel %vm233_vm1, %v256_v23, 0.0 }
  0x75   : > { %v260_v27 = vadd.f32 %v259_v25, %v258_v24  ;;  %v266_v28 = vrot.slane %v265_v26, 4  ;;  %v346_v25 = vsub.s32 %v343_v14, %v904_v29 }
  0x77   : > { %v261_v30 = vrot.slane %v260_v27, 2  ;;  %v267_v31 = vadd.f32 %v266_v28, %v265_v26 }
  0x79   : > { %v262_v32 = vadd.f32 %v261_v30, %v260_v27  ;;  %v268_v33 = vrot.slane %v267_v31, 2 }
  0x7b   : > { %v263_v37 = vrot.slane %v262_v32, 1  ;;  %v269_v38 = vadd.f32 %v268_v33, %v267_v31  ;;  %v362_v31 = vld [vmem:[#allocation3] sm:$0x3] }
  0x7d   : > { %v264_v39 = vadd.f32 %v263_v37, %v262_v32  ;;  %v270_v40 = vrot.slane %v269_v38, 1  ;;  %v337_v32 = vld [vmem:[#allocation2] sm:$0x3] }
  0x7f   : > { %v271_v43 = vadd.f32 %v270_v40, %v269_v38  ;;  %606 = vrcp.f32 %v264_v39 }
  0x81   : > { %608 = vrcp.f32 %v271_v43 }
  0x89   : > { %v607_v48 = vpop.eup %606 }
  0x8b   : > { %v609_v49 = vpop.eup %608 }
  0x8c   : > { %v278_v50 = vcombine.low %v607_v48, %v609_v49 }
  0x8e   : > { %v280_v52 = vmul.f32 %v605_v22, %v278_v50 }
  0x90   : > { %v301_v53 = vmul.f32 %v299_v51, %v280_v52  ;;  %v319_v54 = vadd.f32 %v299_v51, %v280_v52 }
  0x92   : > { %v303_v55 = vcombine.high %v301_v53, %v301_v53  ;;  %v305_v56 = vsel %vm233_vm1, %v301_v53, 0.0  ;;  %v321_v57 = vcombine.high %v319_v54, %v319_v54  ;;  %v323_v58 = vsel %vm233_vm1, %v319_v54, 0.0 }
  0x93   : > { %v306_v59 = vrot.slane %v305_v56, 4  ;;  %v324_v60 = vrot.slane %v323_v58, 4 }
  0x94   : > { %v312_v61 = vsel %vm233_vm1, %v303_v55, 0.0  ;;  %v330_v62 = vsel %vm233_vm1, %v321_v57, 0.0 }
  0x95   : > { %v307_v63 = vadd.f32 %v306_v59, %v305_v56  ;;  %v313_v0 = vrot.slane %v312_v61, 4  ;;  %v325_v2 = vadd.f32 %v324_v60, %v323_v58  ;;  %v331_v3 = vrot.slane %v330_v62, 4 }
  0x97   : > { %v308_v6 = vrot.slane %v307_v63, 2  ;;  %v314_v7 = vadd.f32 %v313_v0, %v312_v61  ;;  %v326_v8 = vrot.slane %v325_v2, 2  ;;  %v332_v9 = vadd.f32 %v331_v3, %v330_v62 }
  0x99   : > { %v309_v10 = vadd.f32 %v308_v6, %v307_v63  ;;  %v315_v11 = vrot.slane %v314_v7, 2  ;;  %v327_v12 = vadd.f32 %v326_v8, %v325_v2  ;;  %v333_v13 = vrot.slane %v332_v9, 2 }
  0x9b   : > { %v310_v15 = vrot.slane %v309_v10, 1  ;;  %v316_v16 = vadd.f32 %v315_v11, %v314_v7  ;;  %v328_v17 = vrot.slane %v327_v12, 1  ;;  %v334_v18 = vadd.f32 %v333_v13, %v332_v9 }
  0x9d   : > { %v311_v19 = vadd.f32 %v310_v15, %v309_v10  ;;  %v317_v20 = vrot.slane %v316_v16, 1  ;;  %v329_v21 = vadd.f32 %v328_v17, %v327_v12  ;;  %v335_v22 = vrot.slane %v334_v18, 1 }
  0x9f   : > { %v318_v23 = vadd.f32 %v317_v20, %v316_v16  ;;  %v336_v24 = vadd.f32 %v335_v22, %v334_v18 }
  0xa1   : > { %v340_v26 = vcombine.low %v311_v19, %v318_v23  ;;  %v365_v27 = vcombine.low %v329_v21, %v336_v24 }
  0xa3   : > { %v347_v28 = vrot.slane %v340_v26, %v346_v25  ;;  %v372_v30 = vrot.slane %v365_v27, %v346_v25 }
  0xa5   : > { %v354_v33 = vrot.slane %v347_v28, %v346_v25  ;;  %v379_v36 = vrot.slane %v372_v30, %v346_v25 }
  0xa7   : > { %v381_v37 = vadd.f32 %v379_v36, %v362_v31  ;;  %v356_v38 = vadd.f32 %v354_v33, %v337_v32 }
  0xa9   : > { %382 = vst.msk [vmem:[#allocation3] sm:$0x3] %vm892_vm0, %v381_v37  ;;  %361 = vst.msk [vmem:[#allocation2] sm:$0x3] %vm892_vm0, %v356_v38 }
  0xb0   : > { %v404_v39 = vld [vmem:[#allocation3] sm:$0x3]  ;;  %v386_v40 = vld [vmem:[#allocation2] sm:$0x3] }
  0xb1   : > { %v409_v29 = vrot.slane %v404_v39, %v907_v34  ;;  %v413_v41 = vrot.slane %v404_v39, %v910_v35  ;;  %v391_v42 = vrot.slane %v386_v40, %v907_v34  ;;  %v395_v43 = vrot.slane %v386_v40, %v910_v35 }
  0xb3   : > { %v416_v44 = vsel %vm398_vm4, %v409_v29, 0.0  ;;  %v417_v45 = vsel %vm398_vm4, %v413_v41, 0.0  ;;  %v399_v46 = vsel %vm398_vm4, %v391_v42, 0.0  ;;  %v400_v47 = vsel %vm398_vm4, %v395_v43, 0.0 }
  0xb4   : > { %v418_v48 = vadd.f32 %v417_v45, %v416_v44  ;;  %v401_v1 = vadd.f32 %v400_v47, %v399_v46 }
  0xb6   : > { %419 = vadd.xlane.f32.xlu0 %v418_v48 }
  0xba   : > { %402 = vadd.xlane.f32.xlu0 %v401_v1 }
 0x143   : > { %v420_v49 = vpop.xlane.xlu0 %419 }
 0x144   : > { %v422_v50 = vadd.f32 1e-08, %v420_v49 }
 0x146   : > { %610 = vrcp.f32 %v422_v50 }
 0x147   : > { %v403_v51 = vpop.xlane.xlu0 %402 }
 0x148   : > { %v421_v52 = vmul.f32 2.0, %v403_v51 }
 0x150   : > { %v611_v53 = vpop.eup %610 }
 0x151   : > { %v424_v34 = vmul.f32 %v611_v53, %v421_v52 }
 0x153   : > { %v425_v35 = vsub.f32 1.0, %v424_v34 }
 0x155   : > { %427 = vst.msk [vmem:[%s217_s4] sm:$0x1] %vm426_vm5, %v425_v35 }
 0x156 PF: > { %s18_s14 = sadd.s32 1, %s726_s14   ;;  %s967_s9 = smov %s710_s10 }
 0x157   : > { %p15_p9 = scmp.ge.s32.totalorder %s18_s14, 4   ;;  %s968_s10 = smov %s714_s11 }
 0x158   : > { %s969_s11 = smov %s796_s21  ;;  %s970_s12 = smov %s722_s13 }
 0x159   : > { %s971_s13 = smov %s973_s16  ;;  %17 = sbr.rel (!%p15_p9) target bundleno = 6 (0x6), region = 89 }
 0x160   :  { %445 = vsyncpa [#allocation5], 1 }
 0x161   :  { %447 = vsyncpa [#allocation5 + $0x1], 1 }
 0x162   :  { %448 = vsyncpa [#allocation7], 1 }
 0x163   :  { %450 = vsyncpa [#allocation7 + $0x1], 1 }

</bundles_post_ra>
